<compile_context>
chip_gen: v5e
topology: v5e:2x2
jax: 0.10.0
libtpu: 0.0.40
codegen_flags: <defaults>
</compile_context>

<pallas_src>
import math
import functools

import jax
import jax.numpy as jnp
from jax.experimental import pallas as pl
from jax.experimental.pallas import tpu as pltpu


def _attention_kernel(dec_ref, enc_ref, wqT_ref, wkvT_ref, woT_ref, b_ref,
                      out_ref, *, head_dim, s_chunk, compact, nh_pad):
    f32 = jnp.float32
    bf16 = jnp.bfloat16
    TB, S, H = enc_ref.shape
    n_chunks = S // s_chunk
    L = nh_pad if compact else H     # lane extent of the score tensor

    # --- 0/1 head masks, built in-kernel (traced constants, no HBM input). ---
    # floor(i / head_dim) via f32 multiply+floor (avoids vector int division);
    # the +0.5 guards against representation error of 1/head_dim.
    def head_ids(shape, dim):
        idx = jax.lax.broadcasted_iota(jnp.int32, shape, dim).astype(f32)
        return jnp.floor((idx + 0.5) * (1.0 / head_dim))

    if compact:
        col_h = jax.lax.broadcasted_iota(jnp.int32, (H, L), 1).astype(f32)
        collapse = jnp.where(head_ids((H, L), 0) == col_h, 1.0, 0.0).astype(bf16)
        row_h = jax.lax.broadcasted_iota(jnp.int32, (L, H), 0).astype(f32)
        expand = jnp.where(row_h == head_ids((L, H), 1), 1.0, 0.0).astype(bf16)
    else:
        collapse = jnp.where(head_ids((H, L), 0) == head_ids((H, L), 1),
                             1.0, 0.0).astype(bf16)
        expand = None

    # --- biases (single bundled input): row0=[bq|0], row1=[bk|bv], row2=[bo|0]
    bq = b_ref[0:1, :H]          # (1, H)  f32
    bkv = b_ref[1:2, :]          # (1, 2H) f32
    bo = b_ref[2:3, :H]          # (1, H)  f32

    # --- query projection (bf16 MXU, f32 accumulate); fold in 1/sqrt(hd). ---
    Q = jnp.dot(dec_ref[...], wqT_ref[...], preferred_element_type=f32) + bq
    Qs = Q * (1.0 / math.sqrt(head_dim))                       # (TB, H) f32

    # --- online-softmax over S-chunks. --------------------------------------
    def chunk(c, carry):
        m_prev, l_prev, acc_prev = carry
        s0 = c * s_chunk
        if not isinstance(s0, int) and s_chunk % 8 == 0:
            s0 = pl.multiple_of(s0, 8)
        enc_c = enc_ref[:, pl.ds(s0, s_chunk), :]              # (TB, SC, H) bf16
        enc2d = enc_c.reshape(TB * s_chunk, H)

        # Fused K|V projection: one (TB*SC, H) @ (H, 2H) bf16 MXU matmul.
        KV = jnp.dot(enc2d, wkvT_ref[...], preferred_element_type=f32) + bkv
        K = KV[:, :H].reshape(TB, s_chunk, H)                  # f32
        V = KV[:, H:].reshape(TB, s_chunk, H)                  # f32

        # Per-head scores: elementwise q*k (VPU, f32) then a 0/1 "sum within
        # head" matmul (MXU).  Replicated layout: L == H (score broadcast over
        # the head's lanes).  Compact layout: L == nh_pad.
        prod = Qs[:, None, :] * K                              # (TB, SC, H) f32
        scores = jnp.dot(prod.reshape(TB * s_chunk, H).astype(bf16), collapse,
                         preferred_element_type=f32).reshape(TB, s_chunk, L)

        # Online softmax over the sequence axis (f32 throughout).
        m_cur = jnp.max(scores, axis=1)                        # (TB, L)
        m_new = jnp.maximum(m_prev, m_cur)
        alpha = jnp.exp(m_prev - m_new)                        # (TB, L)
        p = jnp.exp(scores - m_new[:, None, :])                # (TB, SC, L)
        l_new = alpha * l_prev + jnp.sum(p, axis=1)

        if compact:
            p_h = jnp.dot(p.reshape(TB * s_chunk, L).astype(bf16), expand,
                          preferred_element_type=f32).reshape(TB, s_chunk, H)
            alpha_h = jnp.dot(alpha.astype(bf16), expand,
                              preferred_element_type=f32)      # (TB, H)
        else:
            p_h, alpha_h = p, alpha

        acc_new = alpha_h * acc_prev + jnp.sum(p_h * V, axis=1)  # (TB, H)
        return m_new, l_new, acc_new

    init = (jnp.full((TB, L), -1e30, f32),
            jnp.zeros((TB, L), f32),
            jnp.zeros((TB, H), f32))
    if n_chunks == 1:
        m_f, l_f, acc_f = chunk(0, init)
    else:
        m_f, l_f, acc_f = jax.lax.fori_loop(0, n_chunks, chunk, init)

    l_h = (jnp.dot(l_f.astype(bf16), expand, preferred_element_type=f32)
           if compact else l_f)                                 # (TB, H)
    ctx = acc_f * pl.reciprocal(l_h, approx=True)               # (TB, H) f32

    # --- output projection. --------------------------------------------------
    out = jnp.dot(ctx.astype(bf16), woT_ref[...], preferred_element_type=f32) + bo
    out_ref[...] = out.astype(out_ref.dtype)


def _pick_batch_tile(B, S, H):
    """Largest TB (multiple of 8 dividing B) whose bf16 encoder tile stays
    within ~8 MiB while keeping >= 2 grid steps (megacore / pipelining)."""
    budget = 8 * 1024 * 1024
    best = None
    tb = 8
    while tb * 2 <= B:
        if B % tb == 0 and tb * S * H * 2 <= budget:
            best = tb
        tb += 8
    if best is None:
        best = 8 if (B % 8 == 0 and B >= 16) else B
    return best


def _vmem_limit_bytes():
    cap = 64 * 1024 * 1024
    try:
        info = pltpu.get_tpu_info()
        cap = int(getattr(info, "vmem_capacity_bytes", cap))
    except Exception:
        pass
    # ~48 MiB on v7x (64 MiB physical), ~96-100 MiB on v5e/v6e (128 MiB).
    return int(min(100 * 1024 * 1024, (cap * 3) // 4))


def attention_forward(encoder_outputs, decoder_hidden, params, *, num_heads,
                      batch_tile=None, s_chunk=None, compact=None):
    """encoder_outputs: (B, S, H) f32; decoder_hidden: (B, H) f32 -> (B, H)."""
    B, S, H = encoder_outputs.shape
    assert decoder_hidden.shape == (B, H)
    assert H % num_heads == 0
    head_dim = H // num_heads

    if compact is None:
        # Replicated-lane softmax only when head_dim is small; otherwise use the
        # compact (rows, nh_pad) layout so exp/max/sum are not head_dim-x redundant.
        compact = head_dim > 8
    nh_pad = max(128, -(-num_heads // 128) * 128)

    # Sequence chunking for the online softmax (bounds live intermediates).
    if s_chunk is None:
        s_chunk = S
        while s_chunk > 128 and s_chunk % 2 == 0:
            s_chunk //= 2
    s_chunk = min(s_chunk, S)
    assert S % s_chunk == 0, "s_chunk must divide the sequence length"

    # Batch tiling.
    TB = batch_tile if batch_tile is not None else _pick_batch_tile(B, S, H)
    assert TB == B or (TB % 8 == 0 and B % TB == 0), \
        "batch_tile must equal B or be a multiple of 8 dividing B"
    n_steps = B // TB

    f32, bf16 = jnp.float32, jnp.bfloat16

    # Weight prep (one-time, outside the kernel): pre-transposed, bf16 MXU
    # operands, K|V fused, biases bundled (kept f32 - added post-accumulation).
    wqT = params["wq"].T.astype(bf16)                                   # (H, H)
    wkvT = jnp.concatenate([params["wk"].T, params["wv"].T], axis=1).astype(bf16)  # (H, 2H)
    woT = params["wo"].T.astype(bf16)                                   # (H, H)
    b_all = jnp.zeros((3, 2 * H), f32)
    b_all = b_all.at[0, :H].set(params["bq"].astype(f32))
    b_all = b_all.at[1, :H].set(params["bk"].astype(f32))
    b_all = b_all.at[1, H:].set(params["bv"].astype(f32))
    b_all = b_all.at[2, :H].set(params["bo"].astype(f32))

    # bf16 activations halve the per-step encoder-tile DMA (accumulation in f32).
    enc_bf = encoder_outputs.astype(bf16)
    dec_bf = decoder_hidden.astype(bf16)

    kernel = functools.partial(_attention_kernel, head_dim=head_dim,
                               s_chunk=s_chunk, compact=compact, nh_pad=nh_pad)

    return pl.pallas_call(
        kernel,
        out_shape=jax.ShapeDtypeStruct((B, H), decoder_hidden.dtype),
        grid_spec=pltpu.PrefetchScalarGridSpec(
            num_scalar_prefetch=0,
            grid=(n_steps,),
            in_specs=[
                pl.BlockSpec((TB, H), lambda i: (i, 0)),         # decoder_hidden tile
                pl.BlockSpec((TB, S, H), lambda i: (i, 0, 0)),   # encoder_outputs tile
                pl.BlockSpec((H, H), lambda i: (0, 0)),          # WqT (bf16)
                pl.BlockSpec((H, 2 * H), lambda i: (0, 0)),      # [Wk|Wv]T (bf16)
                pl.BlockSpec((H, H), lambda i: (0, 0)),          # WoT (bf16)
                pl.BlockSpec((3, 2 * H), lambda i: (0, 0)),      # bundled biases (f32)
            ],
            out_specs=pl.BlockSpec((TB, H), lambda i: (i, 0)),
        ),
        compiler_params=pltpu.CompilerParams(
            dimension_semantics=("parallel",),
            vmem_limit_bytes=_vmem_limit_bytes(),
        ),
    )(dec_bf, enc_bf, wqT, wkvT, woT, b_all)


def attention_reference(encoder_outputs, decoder_hidden, params, *, num_heads):
    """Pure-JAX f32 reference mirroring the PyTorch forward."""
    B, S, H = encoder_outputs.shape
    hd = H // num_heads
    q = decoder_hidden[:, None, :]                                    # (B, 1, H)
    Q = q @ params["wq"].T + params["bq"]
    K = encoder_outputs @ params["wk"].T + params["bk"]
    V = encoder_outputs @ params["wv"].T + params["bv"]
    Q = Q.reshape(B, 1, num_heads, hd).transpose(0, 2, 1, 3)
    K = K.reshape(B, S, num_heads, hd).transpose(0, 2, 1, 3)
    V = V.reshape(B, S, num_heads, hd).transpose(0, 2, 1, 3)
    scores = (Q @ K.transpose(0, 1, 3, 2)) / jnp.sqrt(jnp.float32(hd))
    attn = jax.nn.softmax(scores, axis=-1)
    ctx = attn @ V                                                    # (B, nh, 1, hd)
    ctx = ctx.transpose(0, 2, 1, 3).reshape(B, 1, H)
    out = ctx @ params["wo"].T + params["bo"]
    return out[:, 0, :]


def _make_params(key, H):
    keys = jax.random.split(key, 8)
    scale = 1.0 / math.sqrt(H)
    return {
        "wq": jax.random.normal(keys[0], (H, H), jnp.float32) * scale,
        "bq": jax.random.normal(keys[1], (H,), jnp.float32) * 0.1,
        "wk": jax.random.normal(keys[2], (H, H), jnp.float32) * scale,
        "bk": jax.random.normal(keys[3], (H,), jnp.float32) * 0.1,
        "wv": jax.random.normal(keys[4], (H, H), jnp.float32) * scale,
        "bv": jax.random.normal(keys[5], (H,), jnp.float32) * 0.1,
        "wo": jax.random.normal(keys[6], (H, H), jnp.float32) * scale,
        "bo": jax.random.normal(keys[7], (H,), jnp.float32) * 0.1,
    }


if __name__ == "__main__":
    key = jax.random.PRNGKey(0)
    k1, k2 = jax.random.split(key, 2)
    # Tolerances account for bf16 MXU operands + approx reciprocal in softmax.
    ATOL = RTOL = 5e-2

    # --- Test 1: module demo shapes (single chunk, replicated-lane softmax). ---
    B, S, H, nh = 2, 8, 32, 4
    kp, ke, kd = jax.random.split(k1, 3)
    params = _make_params(kp, H)
    enc = jax.random.normal(ke, (B, S, H), jnp.float32)
    dec = jax.random.normal(kd, (B, H), jnp.float32)
    out = jax.block_until_ready(
        attention_forward(enc, dec, params, num_heads=nh))
    ref = attention_reference(enc, dec, params, num_heads=nh)
    assert out.shape == (B, H)
    err = float(jnp.max(jnp.abs(out - ref)))
    assert jnp.allclose(out, ref, atol=ATOL, rtol=RTOL), f"test1 mismatch: {err}"

    # --- Test 2: larger heads -> compact softmax layout + multi-chunk online
    #     softmax (exercises the fori_loop / dynamic S-slice / expand-matmul). --
    B2, S2, H2, nh2 = 2, 16, 256, 8
    kp2, ke2, kd2 = jax.random.split(k2, 3)
    params2 = _make_params(kp2, H2)
    enc2 = jax.random.normal(ke2, (B2, S2, H2), jnp.float32)
    dec2 = jax.random.normal(kd2, (B2, H2), jnp.float32)
    out2 = jax.block_until_ready(
        attention_forward(enc2, dec2, params2, num_heads=nh2, s_chunk=8))
    ref2 = attention_reference(enc2, dec2, params2, num_heads=nh2)
    err2 = float(jnp.max(jnp.abs(out2 - ref2)))
    assert jnp.allclose(out2, ref2, atol=ATOL, rtol=RTOL), f"test2 mismatch: {err2}"

    print("KERNEL_OK")
</pallas_src>

<mosaic_0001>
module attributes {stable_mosaic.version = 11 : i64} {
  func.func @_attention_kernel(%arg0: i32, %arg1: memref<2x32xbf16, #tpu.memory_space<vmem>>, %arg2: memref<2x8x32xbf16, #tpu.memory_space<vmem>>, %arg3: memref<32x32xbf16, #tpu.memory_space<vmem>>, %arg4: memref<32x64xbf16, #tpu.memory_space<vmem>>, %arg5: memref<32x32xbf16, #tpu.memory_space<vmem>>, %arg6: memref<3x64xf32, #tpu.memory_space<vmem>>, %arg7: memref<2x32xf32, #tpu.memory_space<vmem>>) attributes {dimension_semantics = [#tpu.dimension_semantics<parallel>], iteration_bounds = array<i64: 1>, scalar_prefetch = 0 : i64, scratch_operands = 0 : i64, tpu.core_type = #tpu.core_type<tc>, window_params = [{transform_indices = @transform_0, window_bounds = array<i64: 2, 32>}, {transform_indices = @transform_1, window_bounds = array<i64: 2, 8, 32>}, {pipeline_mode = #tpu.pipeline_mode<synchronous>, transform_indices = @transform_2, window_bounds = array<i64: 32, 32>}, {pipeline_mode = #tpu.pipeline_mode<synchronous>, transform_indices = @transform_3, window_bounds = array<i64: 32, 64>}, {pipeline_mode = #tpu.pipeline_mode<synchronous>, transform_indices = @transform_4, window_bounds = array<i64: 32, 32>}, {pipeline_mode = #tpu.pipeline_mode<synchronous>, transform_indices = @transform_5, window_bounds = array<i64: 3, 64>}, {transform_indices = @transform_6, window_bounds = array<i64: 2, 32>}]} {
    %0 = tpu.iota {dimensions = array<i32: 0>} : vector<32x32xi32>
    %1 = arith.sitofp %0 : vector<32x32xi32> to vector<32x32xf32>
    %cst = arith.constant 5.000000e-01 : f32
    %2 = vector.broadcast %cst : f32 to vector<32x32xf32>
    %3 = arith.addf %1, %2 : vector<32x32xf32>
    %cst_0 = arith.constant 1.250000e-01 : f32
    %4 = vector.broadcast %cst_0 : f32 to vector<32x32xf32>
    %5 = arith.mulf %3, %4 : vector<32x32xf32>
    %6 = math.floor %5 : vector<32x32xf32>
    %7 = tpu.iota {dimensions = array<i32: 1>} : vector<32x32xi32>
    %8 = arith.sitofp %7 : vector<32x32xi32> to vector<32x32xf32>
    %cst_1 = arith.constant 5.000000e-01 : f32
    %9 = vector.broadcast %cst_1 : f32 to vector<32x32xf32>
    %10 = arith.addf %8, %9 : vector<32x32xf32>
    %cst_2 = arith.constant 1.250000e-01 : f32
    %11 = vector.broadcast %cst_2 : f32 to vector<32x32xf32>
    %12 = arith.mulf %10, %11 : vector<32x32xf32>
    %13 = math.floor %12 : vector<32x32xf32>
    %14 = arith.cmpf oeq, %6, %13 : vector<32x32xf32>
    %cst_3 = arith.constant 1.000000e+00 : f32
    %cst_4 = arith.constant 0.000000e+00 : f32
    %15 = vector.broadcast %cst_3 : f32 to vector<32x32xf32>
    %16 = vector.broadcast %cst_4 : f32 to vector<32x32xf32>
    %17 = arith.select %14, %15, %16 : vector<32x32xi1>, vector<32x32xf32>
    %18 = arith.truncf %17 : vector<32x32xf32> to vector<32x32xbf16>
    %c0 = arith.constant 0 : index
    %c0_5 = arith.constant 0 : index
    %19 = vector.load %arg6[%c0, %c0_5] : memref<3x64xf32, #tpu.memory_space<vmem>>, vector<1x32xf32>
    %c1 = arith.constant 1 : index
    %c0_6 = arith.constant 0 : index
    %20 = vector.load %arg6[%c1, %c0_6] : memref<3x64xf32, #tpu.memory_space<vmem>>, vector<1x64xf32>
    %c2 = arith.constant 2 : index
    %c0_7 = arith.constant 0 : index
    %21 = vector.load %arg6[%c2, %c0_7] : memref<3x64xf32, #tpu.memory_space<vmem>>, vector<1x32xf32>
    %c0_8 = arith.constant 0 : index
    %c0_9 = arith.constant 0 : index
    %22 = vector.load %arg1[%c0_8, %c0_9] : memref<2x32xbf16, #tpu.memory_space<vmem>>, vector<2x32xbf16>
    %c0_10 = arith.constant 0 : index
    %c0_11 = arith.constant 0 : index
    %23 = vector.load %arg3[%c0_10, %c0_11] : memref<32x32xbf16, #tpu.memory_space<vmem>>, vector<32x32xbf16>
    %cst_12 = arith.constant dense<0.000000e+00> : vector<2x32xf32>
    %24 = tpu.matmul %22, %23, %cst_12 {dimension_numbers = #tpu.dot_dimension_numbers<[1], [0], [0], [1], [0, 0, 1, 1], [], []>} : vector<2x32xbf16>, vector<32x32xbf16>, vector<2x32xf32> -> vector<2x32xf32>
    %25 = vector.broadcast %19 : vector<1x32xf32> to vector<2x32xf32>
    %26 = arith.addf %24, %25 : vector<2x32xf32>
    %cst_13 = arith.constant 0.353553385 : f32
    %27 = vector.broadcast %cst_13 : f32 to vector<2x32xf32>
    %28 = arith.mulf %26, %27 : vector<2x32xf32>
    %cst_14 = arith.constant -1.000000e+30 : f32
    %29 = vector.broadcast %cst_14 : f32 to vector<2x32xf32>
    %cst_15 = arith.constant 0.000000e+00 : f32
    %30 = vector.broadcast %cst_15 : f32 to vector<2x32xf32>
    %cst_16 = arith.constant 0.000000e+00 : f32
    %31 = vector.broadcast %cst_16 : f32 to vector<2x32xf32>
    %c0_17 = arith.constant 0 : index
    %c0_18 = arith.constant 0 : index
    %c0_19 = arith.constant 0 : index
    %32 = vector.load %arg2[%c0_17, %c0_18, %c0_19] : memref<2x8x32xbf16, #tpu.memory_space<vmem>>, vector<2x8x32xbf16>
    %33 = vector.shape_cast %32 : vector<2x8x32xbf16> to vector<16x32xbf16>
    %c0_20 = arith.constant 0 : index
    %c0_21 = arith.constant 0 : index
    %34 = vector.load %arg4[%c0_20, %c0_21] : memref<32x64xbf16, #tpu.memory_space<vmem>>, vector<32x64xbf16>
    %cst_22 = arith.constant dense<0.000000e+00> : vector<16x64xf32>
    %35 = tpu.matmul %33, %34, %cst_22 {dimension_numbers = #tpu.dot_dimension_numbers<[1], [0], [0], [1], [0, 0, 1, 1], [], []>} : vector<16x32xbf16>, vector<32x64xbf16>, vector<16x64xf32> -> vector<16x64xf32>
    %36 = vector.broadcast %20 : vector<1x64xf32> to vector<16x64xf32>
    %37 = arith.addf %35, %36 : vector<16x64xf32>
    %38 = vector.extract_strided_slice %37 {offsets = [0, 0], sizes = [16, 32], strides = [1, 1]} : vector<16x64xf32> to vector<16x32xf32>
    %39 = vector.shape_cast %38 : vector<16x32xf32> to vector<2x8x32xf32>
    %40 = vector.extract_strided_slice %37 {offsets = [0, 32], sizes = [16, 32], strides = [1, 1]} : vector<16x64xf32> to vector<16x32xf32>
    %41 = vector.shape_cast %40 : vector<16x32xf32> to vector<2x8x32xf32>
    %42 = vector.shape_cast %28 : vector<2x32xf32> to vector<2x1x32xf32>
    %43 = vector.broadcast %42 : vector<2x1x32xf32> to vector<2x8x32xf32>
    %44 = arith.mulf %43, %39 : vector<2x8x32xf32>
    %45 = vector.shape_cast %44 : vector<2x8x32xf32> to vector<16x32xf32>
    %46 = arith.truncf %45 : vector<16x32xf32> to vector<16x32xbf16>
    %cst_23 = arith.constant dense<0.000000e+00> : vector<16x32xf32>
    %47 = tpu.matmul %46, %18, %cst_23 {dimension_numbers = #tpu.dot_dimension_numbers<[1], [0], [0], [1], [0, 0, 1, 1], [], []>} : vector<16x32xbf16>, vector<32x32xbf16>, vector<16x32xf32> -> vector<16x32xf32>
    %48 = vector.shape_cast %47 : vector<16x32xf32> to vector<2x8x32xf32>
    %cst_24 = arith.constant dense<0xFF800000> : vector<2x32xf32>
    %49 = vector.multi_reduction <maximumf>, %48, %cst_24 [1] : vector<2x8x32xf32> to vector<2x32xf32>
    %50 = arith.maximumf %29, %49 : vector<2x32xf32>
    %51 = arith.subf %29, %50 : vector<2x32xf32>
    %52 = math.exp %51 : vector<2x32xf32>
    %53 = vector.shape_cast %50 : vector<2x32xf32> to vector<2x1x32xf32>
    %54 = vector.broadcast %53 : vector<2x1x32xf32> to vector<2x8x32xf32>
    %55 = arith.subf %48, %54 : vector<2x8x32xf32>
    %56 = math.exp %55 : vector<2x8x32xf32>
    %57 = arith.mulf %52, %30 : vector<2x32xf32>
    %cst_25 = arith.constant dense<0.000000e+00> : vector<2x32xf32>
    %58 = vector.multi_reduction <add>, %56, %cst_25 [1] : vector<2x8x32xf32> to vector<2x32xf32>
    %59 = arith.addf %57, %58 : vector<2x32xf32>
    %60 = arith.mulf %52, %31 : vector<2x32xf32>
    %61 = arith.mulf %56, %41 : vector<2x8x32xf32>
    %cst_26 = arith.constant dense<0.000000e+00> : vector<2x32xf32>
    %62 = vector.multi_reduction <add>, %61, %cst_26 [1] : vector<2x8x32xf32> to vector<2x32xf32>
    %63 = arith.addf %60, %62 : vector<2x32xf32>
    %64 = tpu.reciprocal %59 {approx = true} : vector<2x32xf32> -> vector<2x32xf32>
    %65 = arith.mulf %63, %64 : vector<2x32xf32>
    %66 = arith.truncf %65 : vector<2x32xf32> to vector<2x32xbf16>
    %c0_27 = arith.constant 0 : index
    %c0_28 = arith.constant 0 : index
    %67 = vector.load %arg5[%c0_27, %c0_28] : memref<32x32xbf16, #tpu.memory_space<vmem>>, vector<32x32xbf16>
    %cst_29 = arith.constant dense<0.000000e+00> : vector<2x32xf32>
    %68 = tpu.matmul %66, %67, %cst_29 {dimension_numbers = #tpu.dot_dimension_numbers<[1], [0], [0], [1], [0, 0, 1, 1], [], []>} : vector<2x32xbf16>, vector<32x32xbf16>, vector<2x32xf32> -> vector<2x32xf32>
    %69 = vector.broadcast %21 : vector<1x32xf32> to vector<2x32xf32>
    %70 = arith.addf %68, %69 : vector<2x32xf32>
    %c0_30 = arith.constant 0 : index
    %c0_31 = arith.constant 0 : index
    %71 = vector.load %arg7[%c0_30, %c0_31] : memref<2x32xf32, #tpu.memory_space<vmem>>, vector<2x32xf32>
    tpu.vector_store %arg7[%c0_30, %c0_31], %70 {strides = array<i32>} : memref<2x32xf32, #tpu.memory_space<vmem>>, vector<2x32xf32>,
    return
  }
  func.func @transform_0(%arg0: i32) -> (i32, i32) {
    %c0_i32 = arith.constant 0 : i32
    %c0_i32_0 = arith.constant 0 : i32
    return %arg0, %c0_i32 : i32, i32
  }
  func.func @transform_1(%arg0: i32) -> (i32, i32, i32) {
    %c0_i32 = arith.constant 0 : i32
    %c0_i32_0 = arith.constant 0 : i32
    %c0_i32_1 = arith.constant 0 : i32
    return %arg0, %c0_i32, %c0_i32_0 : i32, i32, i32
  }
  func.func @transform_2(%arg0: i32) -> (i32, i32) {
    %c0_i32 = arith.constant 0 : i32
    %c0_i32_0 = arith.constant 0 : i32
    %c0_i32_1 = arith.constant 0 : i32
    return %c0_i32, %c0_i32_0 : i32, i32
  }
  func.func @transform_3(%arg0: i32) -> (i32, i32) {
    %c0_i32 = arith.constant 0 : i32
    %c0_i32_0 = arith.constant 0 : i32
    %c0_i32_1 = arith.constant 0 : i32
    return %c0_i32, %c0_i32_0 : i32, i32
  }
  func.func @transform_4(%arg0: i32) -> (i32, i32) {
    %c0_i32 = arith.constant 0 : i32
    %c0_i32_0 = arith.constant 0 : i32
    %c0_i32_1 = arith.constant 0 : i32
    return %c0_i32, %c0_i32_0 : i32, i32
  }
  func.func @transform_5(%arg0: i32) -> (i32, i32) {
    %c0_i32 = arith.constant 0 : i32
    %c0_i32_0 = arith.constant 0 : i32
    %c0_i32_1 = arith.constant 0 : i32
    return %c0_i32, %c0_i32_0 : i32, i32
  }
  func.func @transform_6(%arg0: i32) -> (i32, i32) {
    %c0_i32 = arith.constant 0 : i32
    %c0_i32_0 = arith.constant 0 : i32
    return %arg0, %c0_i32 : i32, i32
  }
}

</mosaic_0001>

<bundles_post_ra>
// kernel: tpu_custom_call.1
= control target key start
LH: loop header
LB: loop body
LE: loop exit
PB: predicated region body
PF: predicated region fallthrough
CT: control target
= control target key end

     0   :  { %11 = vsyncpa [#allocation3], 0  ;;  %s685_s0 = inlined_call_operand.hbm [shape: bf16[2,32], index: 0, kind: input, shape index: {}]   ;;  %s686_s1 = inlined_call_operand.hbm [shape: bf16[2,8,32], index: 1, kind: input, shape index: {}]   ;;  %s687_s2 = inlined_call_operand.hbm [shape: bf16[32,32], index: 2, kind: input, shape index: {}]   ;;  %s688_s3 = inlined_call_operand.hbm [shape: bf16[32,64], index: 3, kind: input, shape index: {}]   ;;  %s689_s4 = inlined_call_operand.hbm [shape: bf16[32,32], index: 4, kind: input, shape index: {}]   ;;  %s690_s5 = inlined_call_operand.vmem [shape: f32[3,64], index: 5, kind: input, shape index: {}]   ;;  %s691_s6 = inlined_call_operand.hbm [shape: f32[2,32], index: 6, kind: output, shape index: {}]  }
   0x1   :  { %12 = vsyncpa [#allocation6], 0 }
   0x2   :  { %13 = vsyncpa [#allocation9], 0  ;;  %s30_s23 = sshll.u32 %s686_s1, 4  ;;  %s31_s23 = int_to_ptr.hbm [resolvable:$true] %s30_s23 }
   0x3   :  { %14 = vsyncpa [#allocation4], 0  ;;  %s603_s24 = smov [#allocation5]   ;;  %s56_s28 = sshll.u32 %s688_s3, 4  ;;  %s57_s28 = int_to_ptr.hbm [resolvable:$true] %s56_s28 }
   0x4   :  { %s32_s25 = sshll.u32 %s603_s24, 4  ;;  %s604_s29 = smov 64   ;;  %s33_s25 = int_to_ptr.vmem [resolvable:$true] %s32_s25 }
   0x5   :  { %s605_s30 = smov 4   ;;  %s606_s7 = smov [#allocation8]  }
   0x6   :  { %38 = dma.hbm_to_vmem [thread:$0]  %s31_s23, 128, %s33_s25, [#allocation6], %s604_s29, %s604_s29, %s605_s30  }
   0x7   :  { %s58_s8 = sshll.u32 %s606_s7, 4  ;;  %s20_s11 = sshll.u32 %s685_s0, 4  ;;  %s59_s8 = int_to_ptr.vmem [resolvable:$true] %s58_s8  ;;  %s21_s11 = int_to_ptr.hbm [resolvable:$true] %s20_s11 }
   0x8   :  { %64 = dma.hbm_to_vmem [thread:$0]  %s57_s28, 256, %s59_s8, [#allocation9], %s604_s29, %s604_s29, %s605_s30  }
   0x9   :  { %s43_s13 = sshll.u32 %s687_s2, 4  ;;  %s607_s14 = smov [#allocation2]   ;;  %s44_s13 = int_to_ptr.hbm [resolvable:$true] %s43_s13 }
   0xa   :  { %s22_s15 = sshll.u32 %s607_s14, 4  ;;  %s608_s3 = smov [#allocation7]   ;;  %s23_s15 = int_to_ptr.vmem [resolvable:$true] %s22_s15 }
   0xb   :  { %25 = dma.hbm_to_vmem [thread:$0]  %s21_s11, 16, %s23_s15, [#allocation3]  }
   0xc   :  { %s45_s16 = sshll.u32 %s608_s3, 4  ;;  %s69_s19 = sshll.u32 %s689_s4, 4  ;;  %s46_s16 = int_to_ptr.vmem [resolvable:$true] %s45_s16  ;;  %s70_s19 = int_to_ptr.hbm [resolvable:$true] %s69_s19 }
   0xd   :  { %51 = dma.hbm_to_vmem [thread:$0]  %s44_s13, 256, %s46_s16, [#allocation6], %s604_s29, %s604_s29, %s605_s30  }
   0xe   :  { %s609_s0 = smov [#allocation10]  }
   0xf   :  { %s71_s20 = sshll.u32 %s609_s0, 4  ;;  %s72_s20 = int_to_ptr.vmem [resolvable:$true] %s71_s20 }
  0x10   :  { %77 = dma.hbm_to_vmem [thread:$0]  %s70_s19, 256, %s72_s20, [#allocation9], %s604_s29, %s604_s29, %s605_s30  }
  0x11   :  { %595 = dma.done.wait [#allocation3], 16  }
  0x12   :  { %596 = vsyncadd [#allocation3], 4294967280 }
  0x13   :  { %597 = dma.done.wait [#allocation6], 384  }
  0x14   :  { %598 = vsyncadd [#allocation6], 4294966912 }
  0x15   :  { %599 = dma.done.wait [#allocation9], 512  }
  0x16   :  { %600 = vsyncadd [#allocation9], 4294966784  ;;  %v420_v0 = vld [vmem:[#allocation7 + $0x8] sm:$0xff]  ;;  %v423_v1 = vld [vmem:[#allocation8 + $0x8] sm:$0xff]  ;;  %vm159_vm0 = vcmask 261120   ;;  %v101_v6 = vlaneseq  ;;  %s611_s23 = smov 96  }
  0x17   :  { %v419_v2 = vld [vmem:[#allocation7] sm:$0xff]  ;;  %169 = vmatpush.bf16.msra.mxu0 %v420_v0  ;;  %210 = vmatpush.bf16.msra.mxu1 %v423_v1  ;;  %v422_v3 = vld [vmem:[#allocation8] sm:$0xff]  ;;  %v421_v4 = vld [vmem:[#allocation5] sm:$0xff]  ;;  %v610_v30 = vmov 1.0|1.0   ;;  %vm331_vm7 = vcmask 1041409  }
  0x18   :  { %v141_v5 = vld [vmem:[#allocation2] sm:$0x1]  ;;  %v102_v7 = vshrl.u32 %v101_v6, 7  ;;  %v123_v10 = vand.u32 127, %v101_v6  ;;  %v436_v33 = vld [vmem:[%s690_s5] ss:$0 sm:$0xff] }
  0x19   :  { %v437_v34 = vld [vmem:[%s690_s5 + $0x1] ss:$0 sm:$0xff]  ;;  %s612_s26 = smov [#allocation11]   ;;  %s371_s30 = sshll.u32 %s691_s6, 4  ;;  %vm362_vm8 = vcmask 254976   ;;  %s372_s30 = int_to_ptr.hbm [resolvable:$true] %s371_s30 }
  0x1a   :  { %v104_v8 = vadd.s32 16, %v102_v7  ;;  %v105_v9 = vadd.s32 24, %v102_v7  ;;  %v124_v13 = vcvt.s32.f32 %v123_v10  ;;  %v103_v17 = vadd.s32 8, %v102_v7  ;;  %s369_s27 = sshll.u32 %s612_s26, 4  ;;  %s370_s27 = int_to_ptr.vmem [resolvable:$true] %s369_s27 }
  0x1b   :  { %170 = vmatpush.bf16.msra.mxu0 %v419_v2  ;;  %211 = vmatpush.bf16.msra.mxu1 %v422_v3  ;;  %v106_v21 = vcvt.s32.f32 %v102_v7  ;;  %v425_v3 = vld [vmem:[#allocation10 + $0x8] sm:$0xff] }
  0x1c   :  { %v108_v11 = vcvt.s32.f32 %v104_v8  ;;  %v109_v12 = vcvt.s32.f32 %v105_v9  ;;  %v125_v16 = vadd.f32 0.5, %v124_v13  ;;  %v107_v22 = vcvt.s32.f32 %v103_v17  ;;  %355 = vmatpush.bf16.msra.mxu3 %v425_v3 }
  0x1d   :  { %v110_v26 = vadd.f32 0.5, %v106_v21 }
  0x1e   :  { %391 = vmatmul.msk.bf16.vlgmr.msra.gmra.mxu0 %vm159_vm0, %v141_v5  ;;  %404 = vmatmul.msk.bf16.vlgmr.msra.gmra.mxu1 %vm159_vm0, %v421_v4  ;;  %v112_v14 = vadd.f32 0.5, %v108_v11  ;;  %v113_v15 = vadd.f32 0.5, %v109_v12  ;;  %v126_v20 = vmul.f32 0.125, %v125_v16  ;;  %v111_v27 = vadd.f32 0.5, %v107_v22  ;;  %v424_v5 = vld [vmem:[#allocation10] sm:$0xff] }
  0x1f   :  { %v114_v28 = vmul.f32 0.125, %v110_v26 }
  0x20   :  { %v116_v18 = vmul.f32 0.125, %v112_v14  ;;  %v117_v19 = vmul.f32 0.125, %v113_v15  ;;  %v127_v25 = vfloor.f32 %v126_v20  ;;  %v115_v29 = vmul.f32 0.125, %v111_v27  ;;  %356 = vmatpush.bf16.msra.mxu3 %v424_v5 }
  0x21   :  { %v118_v31 = vfloor.f32 %v114_v28 }
  0x22   :  { %v120_v23 = vfloor.f32 %v116_v18  ;;  %v121_v24 = vfloor.f32 %v117_v19  ;;  %v119_v32 = vfloor.f32 %v115_v29 }
  0x23   :  { %vm128_vm4 = vcmp.eq.f32.partialorder %v118_v31, %v127_v25 }
  0x24   :  { %vm130_vm1 = vcmp.eq.f32.partialorder %v120_v23, %v127_v25  ;;  %vm131_vm2 = vcmp.eq.f32.partialorder %v121_v24, %v127_v25  ;;  %vm129_vm5 = vcmp.eq.f32.partialorder %v119_v32, %v127_v25 }
  0x25   :  { %vm405_vm3 = vmpackc.low %vm131_vm2, %vm130_vm1 }
  0x26   :  { %406 = vmatpush.bf16.msk.msra.mxu2 %vm405_vm3, %v610_v30  ;;  %vm407_vm6 = vmpackc.low %vm129_vm5, %vm128_vm4 }
  0x2a   :  { %408 = vmatpush.bf16.msk.msra.mxu2 %vm407_vm6, %v610_v30 }
  0x9b   :  { %v172_v35 = vpop.f32.mrf.mxu0  ;;  %v213_v36 = vpop.f32.mrf.mxu1 }
  0x9c   :  { %v173_v37 = vadd.f32 %v436_v33, %v172_v35  ;;  %v214_v38 = vadd.f32 %v437_v34, %v213_v36 }
  0x9e   :  { %v176_v39 = vmul.f32 0.35355338, %v173_v37  ;;  %292 = vrot.lane.b32.xlu0 %v214_v38, %s611_s23 }
  0xa0   :  { %v219_v40 = vrot.slane %v176_v39, 1  ;;  %v220_v41 = vperm.slane %v176_v39, 0 }
  0xa2   :  { %v221_v42 = vperm.slane %v219_v40, 0  ;;  %v224_v46 = vmul.f32 %v220_v41, %v214_v38 }
  0xa3   :  { %v174_v43 = vpop.f32.mrf.mxu0  ;;  %v215_v44 = vpop.f32.mrf.mxu1 }
  0xa4   :  { %v216_v45 = vadd.f32 %v437_v34, %v215_v44 }
  0xa6   :  { %v225_v47 = vmul.f32 %v221_v42, %v216_v45  ;;  %294 = vrot.lane.b32.xlu0 %v216_v45, %s611_s23 }
  0xa8   :  { %v226_v48 = vpack.c.bf16 %v225_v47, %v224_v46 }
  0xaa   :  { %409 = vmatmul.msk.bf16.vlgmr.msra.gmra.mxu2 %vm159_vm0, %v226_v48 }
 0x110   :  { %v293_v9 = vpop.permute.xlu0 %292 }
 0x118   :  { %v295_v24 = vpop.permute.xlu0 %294 }
 0x12d   :  { %v239_v49 = vpop.f32.mrf.mxu2 }
 0x12e   :  { %v244_v50 = vsel %vm159_vm0, %v239_v49, -inf }
 0x12f   :  { %v245_v51 = vrot.slane %v244_v50, 4 }
 0x131   :  { %v246_v52 = vmax.f32 %v244_v50, %v245_v51 }
 0x133   :  { %v247_v53 = vrot.slane %v246_v52, 2 }
 0x135   :  { %v248_v54 = vmax.f32 %v246_v52, %v247_v53  ;;  %v241_v55 = vpop.f32.mrf.mxu2 }
 0x136   :  { %v251_v56 = vsel %vm159_vm0, %v241_v55, -inf }
 0x137   :  { %v249_v57 = vrot.slane %v248_v54, 1  ;;  %v252_v58 = vrot.slane %v251_v56, 4 }
 0x139   :  { %v250_v59 = vmax.f32 %v248_v54, %v249_v57  ;;  %v253_v60 = vmax.f32 %v251_v56, %v252_v58 }
 0x13b   :  { %v258_v61 = vmax.f32 %v250_v59, -1e+30  ;;  %v254_v62 = vrot.slane %v253_v60, 2 }
 0x13d   :  { %v266_v63 = vsub.f32 %v239_v49, %v258_v61  ;;  %v255_v0 = vmax.f32 %v253_v60, %v254_v62  ;;  %v260_v6 = vsub.f32 -1e+30, %v258_v61 }
 0x13f   :  { %v268_v1 = vmul.f32 1.442695, %v266_v63  ;;  %v256_v2 = vrot.slane %v255_v0, 1  ;;  %v262_v10 = vmul.f32 1.442695, %v260_v6 }
 0x141   :  { %v257_v4 = vmax.f32 %v255_v0, %v256_v2  ;;  %439 = vpow2.f32 %v268_v1  ;;  %v438_v1 = vld [vmem:[%s690_s5 + $0x2] ss:$0 sm:$0xff] }
 0x143   :  { %v259_v7 = vmax.f32 %v257_v4, -1e+30 }
 0x145   :  { %v267_v8 = vsub.f32 %v241_v55, %v259_v7  ;;  %v261_v17 = vsub.f32 -1e+30, %v259_v7 }
 0x147   :  { %v270_v11 = vmul.f32 1.442695, %v267_v8  ;;  %v440_v12 = vpop.eup %439  ;;  %v264_v22 = vmul.f32 1.442695, %v261_v17 }
 0x148   :  { %v274_v13 = vsel %vm159_vm0, %v440_v12, 0.0  ;;  %v298_v14 = vmul.f32 %v440_v12, %v293_v9 }
 0x149   :  { %v275_v15 = vrot.slane %v274_v13, 4  ;;  %441 = vpow2.f32 %v270_v11 }
 0x14a   :  { %443 = vpow2.f32 %v262_v10  ;;  %v300_v16 = vsel %vm159_vm0, %v298_v14, 0.0 }
 0x14b   :  { %v276_v18 = vadd.f32 %v275_v15, %v274_v13  ;;  %v301_v19 = vrot.slane %v300_v16, 4  ;;  %445 = vpow2.f32 %v264_v22 }
 0x14d   :  { %v277_v20 = vrot.slane %v276_v18, 2  ;;  %v302_v21 = vadd.f32 %v301_v19, %v300_v16 }
 0x14f   :  { %v442_v23 = vpop.eup %441  ;;  %v278_v25 = vadd.f32 %v277_v20, %v276_v18  ;;  %v303_v27 = vrot.slane %v302_v21, 2 }
 0x150   :  { %v444_v26 = vpop.eup %443  ;;  %v281_v28 = vsel %vm159_vm0, %v442_v23, 0.0  ;;  %v299_v29 = vmul.f32 %v442_v23, %v295_v24 }
 0x151   :  { %v279_v30 = vrot.slane %v278_v25, 1  ;;  %v282_v31 = vrot.slane %v281_v28, 4  ;;  %v272_v33 = vmul.f32 0.0, %v444_v26  ;;  %v304_v37 = vadd.f32 %v303_v27, %v302_v21  ;;  %v446_v43 = vpop.eup %445 }
 0x152   :  { %v307_v32 = vsel %vm159_vm0, %v299_v29, 0.0  ;;  %v273_v47 = vmul.f32 0.0, %v446_v43 }
 0x153   :  { %v280_v34 = vadd.f32 %v279_v30, %v278_v25  ;;  %v283_v35 = vadd.f32 %v282_v31, %v281_v28  ;;  %v308_v36 = vrot.slane %v307_v32, 4  ;;  %v305_v44 = vrot.slane %v304_v37, 1 }
 0x155   :  { %v288_v38 = vadd.f32 %v280_v34, %v272_v33  ;;  %v284_v39 = vrot.slane %v283_v35, 2  ;;  %v309_v40 = vadd.f32 %v308_v36, %v307_v32  ;;  %v306_v49 = vadd.f32 %v305_v44, %v304_v37 }
 0x157   :  { %v285_v41 = vadd.f32 %v284_v39, %v283_v35  ;;  %v310_v42 = vrot.slane %v309_v40, 2  ;;  %447 = vrcp.f32 %v288_v38  ;;  %v314_v53 = vadd.f32 %v306_v49, %v272_v33 }
 0x159   :  { %v286_v45 = vrot.slane %v285_v41, 1  ;;  %v311_v46 = vadd.f32 %v310_v42, %v309_v40 }
 0x15b   :  { %v287_v48 = vadd.f32 %v286_v45, %v285_v41  ;;  %v312_v50 = vrot.slane %v311_v46, 1 }
 0x15d   :  { %v289_v51 = vadd.f32 %v287_v48, %v273_v47  ;;  %v448_v52 = vpop.eup %447  ;;  %v313_v54 = vadd.f32 %v312_v50, %v311_v46 }
 0x15e   :  { %v318_v55 = vmul.f32 %v448_v52, %v314_v53 }
 0x15f   :  { %449 = vrcp.f32 %v289_v51  ;;  %v315_v56 = vadd.f32 %v313_v54, %v273_v47 }
 0x160   :  { %v320_v59 = vpack.c.bf16 %v318_v55, %v318_v55 }
 0x162   :  { %v329_v61 = vunpack.c.l.b16 %v320_v59 }
 0x165   :  { %v450_v57 = vpop.eup %449 }
 0x166   :  { %v319_v58 = vmul.f32 %v450_v57, %v315_v56 }
 0x168   :  { %v321_v60 = vpack.c.bf16 %v319_v58, %v319_v58 }
 0x16a   :  { %v330_v62 = vunpack.c.l.b16 %v321_v60 }
 0x16c   :  { %v332_v63 = vsel %vm331_vm7, %v330_v62, %v329_v61 }
 0x16d   :  { %v333_v0 = vpack.c.b16 %v332_v63, %v332_v63 }
 0x16f   :  { %418 = vmatmul.msk.bf16.vlgmr.msra.gmra.mxu3 %vm159_vm0, %v333_v0 }
 0x1f2   :  { %v358_v2 = vpop.f32.mrf.mxu3 }
 0x1f3   :  { %v359_v3 = vadd.f32 %v438_v1, %v358_v2 }
 0x1f5   :  { %363 = vst.msk [vmem:[#allocation11] sm:$0x3] %vm362_vm8, %v359_v3 }
 0x1f6   :  { %374 = dma.vmem_to_hbm [thread:$0]  %s370_s27, 32, %s372_s30, [#allocation4]  }
 0x1fa   :  { %v360_v4 = vpop.f32.mrf.mxu3 }
 0x1fb   :  { %601 = dma.done.wait [#allocation4], 32  }
 0x1fc   :  { %602 = vsyncadd [#allocation4], 4294967264 }
 0x1fd   :  { %379 = vsyncpa [#allocation3], 1 }
 0x1fe   :  { %380 = vsyncpa [#allocation6], 1 }
 0x1ff   :  { %381 = vsyncpa [#allocation9], 1 }
 0x200   :  { %382 = vsyncpa [#allocation4], 1 }

</bundles_post_ra>
